<compile_context>
chip_gen: v6e
topology: v6e:2x2x1
jax: 0.10.0
libtpu: 0.0.40
codegen_flags: <defaults>
</compile_context>

<pallas_src>
import functools

import jax
import jax.numpy as jnp
from jax.experimental import pallas as pl
from jax.experimental.pallas import tpu as pltpu

HEAD_PAD = 128  # mean-head weight/bias padded to 128 lanes in VMEM (MXU lane granularity)


def _round_up(x, m):
    return ((x + m - 1) // m) * m


def actor_gaussian_kernel(s_ref, w1_ref, b1_ref, w2_ref, b2_ref, wm_ref, bm_ref,
                          mean_ref, *, max_action, action_dim):
    s = s_ref[...]
    # fc1 + tanh
    h1 = jnp.tanh(
        jnp.dot(s, w1_ref[...], preferred_element_type=jnp.float32) + b1_ref[...]
    )
    # fc2 + tanh
    h2 = jnp.tanh(
        jnp.dot(h1, w2_ref[...], preferred_element_type=jnp.float32) + b2_ref[...]
    )
    # mean head: max_action * tanh(linear). The matmul runs on 128 padded lanes (free at
    # MXU granularity); only the first `action_dim` columns are written back to HBM.
    m_lin = jnp.dot(h2, wm_ref[...], preferred_element_type=jnp.float32) + bm_ref[...]
    mean_ref[...] = (max_action * jnp.tanh(m_lin))[:, :action_dim]


@functools.partial(jax.jit, static_argnames=("max_action", "action_dim", "tb"))
def actor_gaussian_forward(s, params, *, max_action, action_dim, tb=None):
    """s: (B, state_dim) f32.  params: pre-transposed pytree from make_params.
    Returns mean: (B, action_dim)."""
    B, state_dim = s.shape
    hidden = params["w1t"].shape[1]

    if tb is None:
        # Big tiles amortize per-grid-step overhead; keep >= 2 tiles when possible so the
        # "parallel" batch axis shards across both TensorCores on v7x.
        tb = min(2048, _round_up(pl.cdiv(B, 2), 8))
    # Never exceed the (8-rounded) batch; always a multiple of 8 (sublane constraint).
    tb = max(8, _round_up(min(tb, _round_up(B, 8)), 8))

    n_tiles = pl.cdiv(B, tb)
    b_pad = n_tiles * tb
    if b_pad != B:
        s = jnp.pad(s, ((0, b_pad - B), (0, 0)))

    resident = lambda i: (0, 0)          # weights/biases: same block every grid step
    batched = lambda i: (i, 0)           # activations/outputs: tile over batch

    mean = pl.pallas_call(
        functools.partial(actor_gaussian_kernel,
                          max_action=max_action, action_dim=action_dim),
        out_shape=jax.ShapeDtypeStruct((b_pad, action_dim), jnp.float32),
        grid=(n_tiles,),
        in_specs=[
            pl.BlockSpec((tb, state_dim), batched),          # s
            pl.BlockSpec((state_dim, hidden), resident),     # w1t
            pl.BlockSpec((1, hidden), resident),             # b1
            pl.BlockSpec((hidden, hidden), resident),        # w2t
            pl.BlockSpec((1, hidden), resident),             # b2
            pl.BlockSpec((hidden, HEAD_PAD), resident),      # wmt (lane-padded in VMEM)
            pl.BlockSpec((1, HEAD_PAD), resident),           # bm  (lane-padded in VMEM)
        ],
        out_specs=pl.BlockSpec((tb, action_dim), batched),   # narrow HBM writeback
        compiler_params=pltpu.CompilerParams(
            dimension_semantics=("parallel",),
        ),
    )(s, params["w1t"], params["b1"], params["w2t"], params["b2"],
      params["wmt"], params["bm"])

    if b_pad != B:
        mean = mean[:B]
    return mean


def orthogonal_init(key, shape, gain=1.0):
    """Orthogonal init matching nn.init.orthogonal_ semantics on an (out, in) weight."""
    rows, cols = shape
    n, m = max(rows, cols), min(rows, cols)
    a = jax.random.normal(key, (n, m), dtype=jnp.float32)
    q, r = jnp.linalg.qr(a)
    d = jnp.sign(jnp.diagonal(r))
    q = q * d[None, :]
    if rows < cols:
        q = q.T
    return gain * q[:rows, :cols]


def make_params(key, state_dim, hidden_width, action_dim):
    """Pre-transposed params: weights as (in, out), biases as (1, out); mean head padded
    to HEAD_PAD lanes (zero columns) for MXU-friendly layout inside the kernel.
    Gains match the PyTorch module: 1.0 for fc1/fc2 (nn.init default), 0.01 for mean."""
    k1, k2, k3 = jax.random.split(key, 3)
    w1 = orthogonal_init(k1, (hidden_width, state_dim), gain=1.0)      # (out, in)
    w2 = orthogonal_init(k2, (hidden_width, hidden_width), gain=1.0)
    wm = orthogonal_init(k3, (action_dim, hidden_width), gain=0.01)

    wmt_padded = jnp.zeros((hidden_width, HEAD_PAD), jnp.float32).at[:, :action_dim].set(wm.T)
    bm_padded = jnp.zeros((1, HEAD_PAD), jnp.float32)                  # bias init = 0

    return {
        "w1t": w1.T,                                      # (state_dim, hidden)
        "b1": jnp.zeros((1, hidden_width), jnp.float32),
        "w2t": w2.T,                                      # (hidden, hidden)
        "b2": jnp.zeros((1, hidden_width), jnp.float32),
        "wmt": wmt_padded,                                # (hidden, HEAD_PAD)
        "bm": bm_padded,                                  # (1, HEAD_PAD)
        # log_std is a free parameter used only by get_dist(), not by forward().
        "log_std": jnp.zeros((1, action_dim), jnp.float32),
    }


if __name__ == "__main__":
    key = jax.random.PRNGKey(0)
    k_param, k_s1, k_s2 = jax.random.split(key, 3)

    state_dim, hidden_width, action_dim = 16, 32, 4
    max_action = 2.0

    params = make_params(k_param, state_dim, hidden_width, action_dim)

    # Pure-JAX reference (same math, no Pallas)
    def ref(s):
        h1 = jnp.tanh(s @ params["w1t"] + params["b1"])
        h2 = jnp.tanh(h1 @ params["w2t"] + params["b2"])
        m = h2 @ params["wmt"][:, :action_dim] + params["bm"][:, :action_dim]
        return max_action * jnp.tanh(m)

    # Small batch (single tile path), module-consistent shapes.
    s_small = jax.random.normal(k_s1, (8, state_dim), dtype=jnp.float32)
    mean_small = actor_gaussian_forward(s_small, params,
                                        max_action=max_action, action_dim=action_dim)
    jax.block_until_ready(mean_small)
    assert mean_small.shape == (8, action_dim)
    assert jnp.allclose(mean_small, ref(s_small), atol=1e-5, rtol=1e-5)

    # Ragged batch: exercises the multi-tile grid (>=2 tiles -> v7x megacore) + pad path.
    s_big = jax.random.normal(k_s2, (300, state_dim), dtype=jnp.float32)
    mean_big = actor_gaussian_forward(s_big, params,
                                      max_action=max_action, action_dim=action_dim)
    jax.block_until_ready(mean_big)
    assert mean_big.shape == (300, action_dim)
    assert jnp.allclose(mean_big, ref(s_big), atol=1e-5, rtol=1e-5)

    # TODO(synk): get_dist() (torch.distributions.Normal from mean + exp(log_std)) has no
    # kernel-side equivalent; log_std is exposed in params for the caller.

    print("KERNEL_OK")
</pallas_src>

<mosaic_0001>
module attributes {stable_mosaic.version = 11 : i64} {
  func.func @actor_gaussian_kernel(%arg0: i32, %arg1: memref<8x16xf32, #tpu.memory_space<vmem>>, %arg2: memref<16x32xf32, #tpu.memory_space<vmem>>, %arg3: memref<1x32xf32, #tpu.memory_space<vmem>>, %arg4: memref<32x32xf32, #tpu.memory_space<vmem>>, %arg5: memref<1x32xf32, #tpu.memory_space<vmem>>, %arg6: memref<32x128xf32, #tpu.memory_space<vmem>>, %arg7: memref<1x128xf32, #tpu.memory_space<vmem>>, %arg8: memref<8x4xf32, #tpu.memory_space<vmem>>) attributes {dimension_semantics = [#tpu.dimension_semantics<parallel>], iteration_bounds = array<i64: 1>, scalar_prefetch = 0 : i64, scratch_operands = 0 : i64, tpu.core_type = #tpu.core_type<tc>, window_params = [{transform_indices = @transform_0, window_bounds = array<i64: 8, 16>}, {pipeline_mode = #tpu.pipeline_mode<synchronous>, transform_indices = @transform_1, window_bounds = array<i64: 16, 32>}, {pipeline_mode = #tpu.pipeline_mode<synchronous>, transform_indices = @transform_2, window_bounds = array<i64: 1, 32>}, {pipeline_mode = #tpu.pipeline_mode<synchronous>, transform_indices = @transform_3, window_bounds = array<i64: 32, 32>}, {pipeline_mode = #tpu.pipeline_mode<synchronous>, transform_indices = @transform_4, window_bounds = array<i64: 1, 32>}, {pipeline_mode = #tpu.pipeline_mode<synchronous>, transform_indices = @transform_5, window_bounds = array<i64: 32, 128>}, {pipeline_mode = #tpu.pipeline_mode<synchronous>, transform_indices = @transform_6, window_bounds = array<i64: 1, 128>}, {transform_indices = @transform_7, window_bounds = array<i64: 8, 4>}]} {
    %c0 = arith.constant 0 : index
    %c0_0 = arith.constant 0 : index
    %0 = vector.load %arg1[%c0, %c0_0] : memref<8x16xf32, #tpu.memory_space<vmem>>, vector<8x16xf32>
    %c0_1 = arith.constant 0 : index
    %c0_2 = arith.constant 0 : index
    %1 = vector.load %arg2[%c0_1, %c0_2] : memref<16x32xf32, #tpu.memory_space<vmem>>, vector<16x32xf32>
    %cst = arith.constant dense<0.000000e+00> : vector<8x32xf32>
    %2 = tpu.matmul %0, %1, %cst {dimension_numbers = #tpu.dot_dimension_numbers<[1], [0], [0], [1], [0, 0, 1, 1], [], []>} : vector<8x16xf32>, vector<16x32xf32>, vector<8x32xf32> -> vector<8x32xf32>
    %c0_3 = arith.constant 0 : index
    %c0_4 = arith.constant 0 : index
    %3 = vector.load %arg3[%c0_3, %c0_4] : memref<1x32xf32, #tpu.memory_space<vmem>>, vector<1x32xf32>
    %4 = vector.broadcast %3 : vector<1x32xf32> to vector<8x32xf32>
    %5 = arith.addf %2, %4 : vector<8x32xf32>
    %6 = math.tanh %5 : vector<8x32xf32>
    %c0_5 = arith.constant 0 : index
    %c0_6 = arith.constant 0 : index
    %7 = vector.load %arg4[%c0_5, %c0_6] : memref<32x32xf32, #tpu.memory_space<vmem>>, vector<32x32xf32>
    %cst_7 = arith.constant dense<0.000000e+00> : vector<8x32xf32>
    %8 = tpu.matmul %6, %7, %cst_7 {dimension_numbers = #tpu.dot_dimension_numbers<[1], [0], [0], [1], [0, 0, 1, 1], [], []>} : vector<8x32xf32>, vector<32x32xf32>, vector<8x32xf32> -> vector<8x32xf32>
    %c0_8 = arith.constant 0 : index
    %c0_9 = arith.constant 0 : index
    %9 = vector.load %arg5[%c0_8, %c0_9] : memref<1x32xf32, #tpu.memory_space<vmem>>, vector<1x32xf32>
    %10 = vector.broadcast %9 : vector<1x32xf32> to vector<8x32xf32>
    %11 = arith.addf %8, %10 : vector<8x32xf32>
    %12 = math.tanh %11 : vector<8x32xf32>
    %c0_10 = arith.constant 0 : index
    %c0_11 = arith.constant 0 : index
    %13 = vector.load %arg6[%c0_10, %c0_11] : memref<32x128xf32, #tpu.memory_space<vmem>>, vector<32x128xf32>
    %cst_12 = arith.constant dense<0.000000e+00> : vector<8x128xf32>
    %14 = tpu.matmul %12, %13, %cst_12 {dimension_numbers = #tpu.dot_dimension_numbers<[1], [0], [0], [1], [0, 0, 1, 1], [], []>} : vector<8x32xf32>, vector<32x128xf32>, vector<8x128xf32> -> vector<8x128xf32>
    %c0_13 = arith.constant 0 : index
    %c0_14 = arith.constant 0 : index
    %15 = vector.load %arg7[%c0_13, %c0_14] : memref<1x128xf32, #tpu.memory_space<vmem>>, vector<1x128xf32>
    %16 = vector.broadcast %15 : vector<1x128xf32> to vector<8x128xf32>
    %17 = arith.addf %14, %16 : vector<8x128xf32>
    %18 = math.tanh %17 : vector<8x128xf32>
    %cst_15 = arith.constant 2.000000e+00 : f32
    %19 = vector.broadcast %cst_15 : f32 to vector<8x128xf32>
    %20 = arith.mulf %19, %18 : vector<8x128xf32>
    %21 = vector.extract_strided_slice %20 {offsets = [0, 0], sizes = [8, 4], strides = [1, 1]} : vector<8x128xf32> to vector<8x4xf32>
    %c0_16 = arith.constant 0 : index
    %c0_17 = arith.constant 0 : index
    %22 = vector.load %arg8[%c0_16, %c0_17] : memref<8x4xf32, #tpu.memory_space<vmem>>, vector<8x4xf32>
    tpu.vector_store %arg8[%c0_16, %c0_17], %21 {strides = array<i32>} : memref<8x4xf32, #tpu.memory_space<vmem>>, vector<8x4xf32>,
    return
  }
  func.func @transform_0(%arg0: i32) -> (i32, i32) {
    %c0_i32 = arith.constant 0 : i32
    %c0_i32_0 = arith.constant 0 : i32
    return %arg0, %c0_i32 : i32, i32
  }
  func.func @transform_1(%arg0: i32) -> (i32, i32) {
    %c0_i32 = arith.constant 0 : i32
    %c0_i32_0 = arith.constant 0 : i32
    %c0_i32_1 = arith.constant 0 : i32
    return %c0_i32, %c0_i32_0 : i32, i32
  }
  func.func @transform_2(%arg0: i32) -> (i32, i32) {
    %c0_i32 = arith.constant 0 : i32
    %c0_i32_0 = arith.constant 0 : i32
    %c0_i32_1 = arith.constant 0 : i32
    return %c0_i32, %c0_i32_0 : i32, i32
  }
  func.func @transform_3(%arg0: i32) -> (i32, i32) {
    %c0_i32 = arith.constant 0 : i32
    %c0_i32_0 = arith.constant 0 : i32
    %c0_i32_1 = arith.constant 0 : i32
    return %c0_i32, %c0_i32_0 : i32, i32
  }
  func.func @transform_4(%arg0: i32) -> (i32, i32) {
    %c0_i32 = arith.constant 0 : i32
    %c0_i32_0 = arith.constant 0 : i32
    %c0_i32_1 = arith.constant 0 : i32
    return %c0_i32, %c0_i32_0 : i32, i32
  }
  func.func @transform_5(%arg0: i32) -> (i32, i32) {
    %c0_i32 = arith.constant 0 : i32
    %c0_i32_0 = arith.constant 0 : i32
    %c0_i32_1 = arith.constant 0 : i32
    return %c0_i32, %c0_i32_0 : i32, i32
  }
  func.func @transform_6(%arg0: i32) -> (i32, i32) {
    %c0_i32 = arith.constant 0 : i32
    %c0_i32_0 = arith.constant 0 : i32
    %c0_i32_1 = arith.constant 0 : i32
    return %c0_i32, %c0_i32_0 : i32, i32
  }
  func.func @transform_7(%arg0: i32) -> (i32, i32) {
    %c0_i32 = arith.constant 0 : i32
    %c0_i32_0 = arith.constant 0 : i32
    return %arg0, %c0_i32 : i32, i32
  }
}

</mosaic_0001>

<bundles_post_ra>
// kernel: actor_gaussian_forward.1
= control target key start
LH: loop header
LB: loop body
LE: loop exit
PB: predicated region body
PF: predicated region fallthrough
CT: control target
= control target key end

     0   :  { %12 = vsyncpa [#allocation3], 0  ;;  %s576_s0 = inlined_call_operand.hbm [shape: f32[8,16], index: 0, kind: input, shape index: {}]   ;;  %s577_s1 = inlined_call_operand.hbm [shape: f32[16,32], index: 1, kind: input, shape index: {}]   ;;  %s578_s2 = inlined_call_operand.vmem [shape: f32[1,32], index: 2, kind: input, shape index: {}]   ;;  %s579_s3 = inlined_call_operand.hbm [shape: f32[32,32], index: 3, kind: input, shape index: {}]   ;;  %s580_s4 = inlined_call_operand.vmem [shape: f32[1,32], index: 4, kind: input, shape index: {}]   ;;  %s581_s5 = inlined_call_operand.hbm [shape: f32[32,128], index: 5, kind: input, shape index: {}]   ;;  %s582_s6 = inlined_call_operand.vmem [shape: f32[1,128], index: 6, kind: input, shape index: {}]   ;;  %s583_s7 = inlined_call_operand.vmem [shape: f32[8,4], index: 7, kind: output, shape index: {}]  }
   0x1   :  { %13 = vsyncpa [#allocation5], 0 }
   0x2   :  { %14 = vsyncpa [#allocation8], 0  ;;  %s493_s24 = smov [#allocation4]  }
   0x3   :  { %s30_s25 = sshll.u32 %s493_s24, 4  ;;  %s31_s25 = int_to_ptr.vmem [resolvable:$true] %s30_s25 }
   0x4   :  { %s415_s26 = scalar_lea.vmem %s31_s25, 256  ;;  %p420_p1 = scmp.lt.s32.totalorder %s31_s25, %s31_s25 }
   0x5   :  { %p416_p0 = scmp.ne.s32.totalorder %s31_s25, %s415_s26  ;;  %p421_p2 = scmp.lt.s32.totalorder %s415_s26, %s415_s26 }
   0x7   :  { %p422_p3 = por %p421_p2, %p420_p1 }
   0x9   :  { %p423_p4 = pnand %p422_p3, %p416_p0 }
   0xb   :  { %426 = shalt.err (!%p423_p4)
}
   0xc   :  { %s494_s27 = smov 128   ;;  %s495_s28 = smov 8  }
   0xd   :  { %36 = dma.hbm_to_vmem [thread:$0]  %s577_s1, 256, %s31_s25, [#allocation5], %s494_s27, %s494_s27, %s495_s28  }
   0xe   :  { %s496_s8 = smov [#allocation2]   ;;  %s497_s10 = smov [#allocation6]  }
   0xf   :  { %s21_s9 = sshll.u32 %s496_s8, 4  ;;  %s44_s11 = sshll.u32 %s497_s10, 4  ;;  %s22_s9 = int_to_ptr.vmem [resolvable:$true] %s21_s9  ;;  %s45_s11 = int_to_ptr.vmem [resolvable:$true] %s44_s11 }
  0x10   :  { %s435_s12 = scalar_lea.vmem %s22_s9, 128  ;;  %p440_p6 = scmp.lt.s32.totalorder %s22_s9, %s22_s9 }
  0x11   :  { %p436_p5 = scmp.ne.s32.totalorder %s22_s9, %s435_s12  ;;  %p441_p7 = scmp.lt.s32.totalorder %s435_s12, %s435_s12 }
  0x13   :  { %p442_p8 = por %p441_p7, %p440_p6 }
  0x15   :  { %p443_p9 = pnand %p442_p8, %p436_p5 }
  0x17   :  { %446 = shalt.err (!%p443_p9)
}
  0x18   :  { %24 = dma.hbm_to_vmem [thread:$0]  %s576_s0, 128, %s22_s9, [#allocation3]  }
  0x19   :  { %s455_s15 = scalar_lea.vmem %s45_s11, 512  ;;  %p460_p11 = scmp.lt.s32.totalorder %s45_s11, %s45_s11 }
  0x1a   :  { %p456_p10 = scmp.ne.s32.totalorder %s45_s11, %s455_s15  ;;  %p461_p12 = scmp.lt.s32.totalorder %s455_s15, %s455_s15 }
  0x1c   :  { %p462_p13 = por %p461_p12, %p460_p11 }
  0x1e   :  { %p463_p0 = pnand %p462_p13, %p456_p10 }
  0x20   :  { %466 = shalt.err (!%p463_p0)
}
  0x21   :  { %50 = dma.hbm_to_vmem [thread:$0]  %s579_s3, 512, %s45_s11, [#allocation5], %s494_s27, %s494_s27, %s495_s28  }
  0x22   :  { %s498_s17 = smov [#allocation7]  }
  0x23   :  { %s58_s18 = sshll.u32 %s498_s17, 4  ;;  %s59_s18 = int_to_ptr.vmem [resolvable:$true] %s58_s18 }
  0x24   :  { %s475_s19 = scalar_lea.vmem %s59_s18, 512  ;;  %p480_p2 = scmp.lt.s32.totalorder %s59_s18, %s59_s18 }
  0x25   :  { %p476_p1 = scmp.ne.s32.totalorder %s59_s18, %s475_s19  ;;  %p481_p3 = scmp.lt.s32.totalorder %s475_s19, %s475_s19 }
  0x27   :  { %p482_p4 = por %p481_p3, %p480_p2 }
  0x29   :  { %p483_p5 = pnand %p482_p4, %p476_p1 }
  0x2b   :  { %486 = shalt.err (!%p483_p5)
}
  0x2c   :  { %64 = dma.hbm_to_vmem [thread:$0]  %s581_s5, 512, %s59_s18, [#allocation8], %s494_s27, %s494_s27, %s495_s28  }
  0x2d   :  { %487 = dma.done.wait [#allocation3], 128  }
  0x2e   :  { %488 = vsyncadd [#allocation3], 4294967168 }
  0x2f   :  { %489 = dma.done.wait [#allocation5], 768  }
  0x30   :  { %490 = vsyncadd [#allocation5], 4294966528 }
  0x31   :  { %491 = dma.done.wait [#allocation8], 512  }
  0x32   :  { %492 = vsyncadd [#allocation8], 4294966784  ;;  %v499_v0 = vmov 0.0   ;;  %vm500_vm0 = vmmov 0   ;;  %v81_v1 = vld [vmem:[#allocation4 + $0x8] sm:$0xff]  ;;  %v80_v2 = vld [vmem:[#allocation4] sm:$0xff] }
  0x33   :  { %364 = vmatprep.subr.mxu0 %v499_v0  ;;  %368 = vmatprep.mubr.msk.f32.mxu0 %vm500_vm0, %v499_v0  ;;  %v79_v3 = vld [vmem:[#allocation2] sm:$0xff]  ;;  %vm89_vm1 = vcmask 130048   ;;  %v167_v4 = vld [vmem:[#allocation6 + $0x18] sm:$0xff]  ;;  %v166_v5 = vld [vmem:[#allocation6 + $0x10] sm:$0xff]  ;;  %vm175_vm2 = vcmask 261120   ;;  %vm336_vm3 = vcmask 31744  }
  0x34   :  { %371 = vmatprep.subr.mxu1 %v499_v0  ;;  %379 = vmatprep.mubr.msk.f32.mxu1 %vm500_vm0, %v499_v0  ;;  %v165_v6 = vld [vmem:[#allocation6 + $0x8] sm:$0xff]  ;;  %v164_v7 = vld [vmem:[#allocation6] sm:$0xff]  ;;  %v253_v13 = vld [vmem:[#allocation7 + $0x18] sm:$0xff] }
  0x35   :  { %365 = vmatpush3.msra.mxu0 %v81_v1  ;;  %372 = vmatpush3.msra.mxu1 %v167_v4  ;;  %v345_v8 = vld [vmem:[%s578_s2] ss:$0 sm:$0xff]  ;;  %v252_v14 = vld [vmem:[#allocation7 + $0x10] sm:$0xff]  ;;  %v250_v16 = vld [vmem:[#allocation7] sm:$0xff] }
  0x36   :  { %366 = vmatprep.subr.mxu0 %v499_v0  ;;  %373 = vmatprep.subr.mxu1 %v499_v0  ;;  %v251_v15 = vld [vmem:[#allocation7 + $0x8] sm:$0xff] }
  0x37   :  { %367 = vmatpush3.msra.mxu0 %v80_v2  ;;  %374 = vmatpush3.msra.mxu1 %v166_v5  ;;  %v347_v17 = vld [vmem:[%s580_s4] ss:$0 sm:$0xff] }
  0x38   :  { %369 = vmatmul.mubr.msk.f32.vlgmr.msra.gmra.mxu0 %vm89_vm1, %v79_v3  ;;  %382 = vmatprep.subr.mxu0 %v499_v0  ;;  %v349_v22 = vld [vmem:[%s582_s6] ss:$0 sm:$0xff] }
  0x39   :  { %390 = vmatprep.mubr.msk.f32.mxu0 %vm500_vm0, %v499_v0  ;;  %375 = vmatprep.subr.mxu1 %v499_v0 }
  0x3a   :  { %376 = vmatpush3.msra.mxu1 %v165_v6  ;;  %383 = vmatpush3.msra.mxu0 %v253_v13 }
  0x3b   :  { %377 = vmatprep.subr.mxu1 %v499_v0  ;;  %384 = vmatprep.subr.mxu0 %v499_v0 }
  0x3c   :  { %378 = vmatpush3.msra.mxu1 %v164_v7  ;;  %385 = vmatpush3.msra.mxu0 %v252_v14 }
  0x3d   :  { %386 = vmatprep.subr.mxu0 %v499_v0 }
  0x3e   :  { %387 = vmatpush3.msra.mxu0 %v251_v15 }
  0x3f   :  { %388 = vmatprep.subr.mxu0 %v499_v0 }
  0x40   :  { %389 = vmatpush3.msra.mxu0 %v250_v16 }
  0xf8   :  { %v159_v9 = vpop.f32.mrf.mxu0 }
  0xf9   :  { %v160_v10 = vadd.f32 %v345_v8, %v159_v9 }
  0xfa   :  { %v370_v11 = vpop.f32.mrf.mxu0 }
  0xfb   :  { %401 = vtanh.f32 %v160_v10 }
 0x108   :  { %v402_v12 = vpop.eup %401 }
 0x109   :  { %380 = vmatmul.mubr.msk.f32.vlgmr.msra.gmra.mxu1 %vm175_vm2, %v402_v12 }
 0x1c9   :  { %v245_v18 = vpop.f32.mrf.mxu1 }
 0x1ca   :  { %v246_v19 = vadd.f32 %v347_v17, %v245_v18 }
 0x1cb   :  { %v381_v20 = vpop.f32.mrf.mxu1 }
 0x1cc   :  { %403 = vtanh.f32 %v246_v19 }
 0x1d9   :  { %v404_v21 = vpop.eup %403 }
 0x1da   :  { %391 = vmatmul.mubr.msk.f32.vlgmr.msra.gmra.mxu0 %vm175_vm2, %v404_v21 }
 0x29a   :  { %v330_v23 = vpop.f32.mrf.mxu0 }
 0x29b   :  { %v331_v24 = vadd.f32 %v349_v22, %v330_v23 }
 0x29c   :  { %v392_v25 = vpop.f32.mrf.mxu0 }
 0x29d   :  { %405 = vtanh.f32 %v331_v24 }
 0x2aa   :  { %v406_v26 = vpop.eup %405 }
 0x2ab   :  { %v335_v27 = vmul.f32 2.0, %v406_v26 }
 0x2ad   :  { %337 = vst.msk [vmem:[%s583_s7] sm:$0xff] %vm336_vm3, %v335_v27 }
 0x2ae   :  { %342 = vsyncpa [#allocation3], 1 }
 0x2af   :  { %343 = vsyncpa [#allocation5], 1 }
 0x2b0   :  { %344 = vsyncpa [#allocation8], 1 }

</bundles_post_ra>
